<compile_context>
chip_gen: v7x
topology: tpu7x:2x2x1
jax: 0.10.0
libtpu: 0.0.40
codegen_flags: <defaults>
</compile_context>

<pallas_src>
import functools

import jax
import jax.numpy as jnp
from jax.experimental import pallas as pl
from jax.experimental.pallas import tpu as pltpu


def _cdiv(a, b):
    return -(-a // b)


def _round_up(x, m):
    return _cdiv(x, m) * m


def _vmem_budget_bytes():
    """Generation-aware scoped-VMEM budget (~0.8 x physical per-core VMEM)."""
    cap = 64 * 1024 * 1024  # conservative fallback: v7x per-TC VMEM
    try:
        cap = pltpu.get_tpu_info().vmem_capacity_bytes
    except Exception:
        pass
    return int(cap * 0.8)


# ----------------------------------------------------------------------------- kernels


def _ffn_kernel_resident(x_ref, w1_ref, b1_ref, w2_ref, b2_ref, o_ref):
    # 1-D grid over row tiles; full hidden dim resident in VMEM.
    # x_ref: (bm, d_model)  w1_ref: (d_model, hidden)  b1_ref: (1, hidden)
    # w2_ref: (hidden, d_model)  b2_ref: (1, d_model)  o_ref: (bm, d_model)
    h = jnp.dot(x_ref[...], w1_ref[...], preferred_element_type=jnp.float32)
    h = jnp.maximum(h + b1_ref[...].astype(jnp.float32), 0.0)
    # dropout: identity (eval mode) -- see TODO(synk) above.
    y = jnp.dot(h.astype(w2_ref.dtype), w2_ref[...], preferred_element_type=jnp.float32)
    o_ref[...] = (y + b2_ref[...].astype(jnp.float32)).astype(o_ref.dtype)


def _ffn_kernel_htiled(x_ref, w1_ref, b1_ref, w2_ref, b2_ref, o_ref, acc_ref):
    # 2-D grid: axis 0 row tiles ("parallel"), axis 1 hidden tiles ("arbitrary" reduction).
    # acc_ref: (bm, d_model) f32 scratch, resident across the hidden axis.
    h_idx = pl.program_id(1)

    h = jnp.dot(x_ref[...], w1_ref[...], preferred_element_type=jnp.float32)
    h = jnp.maximum(h + b1_ref[...].astype(jnp.float32), 0.0)
    # dropout: identity (eval mode) -- see TODO(synk) above.
    part = jnp.dot(h.astype(w2_ref.dtype), w2_ref[...], preferred_element_type=jnp.float32)

    @pl.when(h_idx == 0)
    def _():
        # fold b2 into the first partial: no zero-fill pass, no finalize add
        acc_ref[...] = part + b2_ref[...].astype(jnp.float32)

    @pl.when(h_idx != 0)
    def _():
        acc_ref[...] += part

    @pl.when(h_idx == pl.num_programs(1) - 1)
    def _():
        o_ref[...] = acc_ref[...].astype(o_ref.dtype)


# ----------------------------------------------------------------------------- tiling


def _choose_tiles(M, d_model, hidden, x_itemsize, w_itemsize, budget, block_m, block_h):
    """Pick (block_m, block_h). block_h == hidden => weights VMEM-resident (1-D grid);
    otherwise hidden is tiled (2-D grid with f32 accumulator)."""

    def fits(bm, bh, tiled):
        w = 2 * 2 * d_model * bh * w_itemsize        # W1 + W2 tiles, double-buffered
        b = 2 * 2 * (bh + d_model) * w_itemsize      # biases, double-buffered
        io = 2 * 2 * bm * d_model * x_itemsize       # x + out row tiles, double-buffered
        acc = bm * d_model * 4 if tiled else 0       # f32 accumulator scratch
        tmp = bm * bh * 4 + bm * d_model * 4         # f32 intermediates (h, partial)
        return w + b + io + acc + tmp <= budget

    def clamp_m(bm):
        return max(16, _round_up(min(bm, _round_up(M, 16)), 16))

    big_vmem = budget > 60 * 1024 * 1024  # v5e/v6e (128 MiB physical) vs v7x (64 MiB)

    # --- user forced hidden tiling ------------------------------------------------
    if block_h is not None and block_h < hidden:
        assert block_h % 128 == 0 and hidden % block_h == 0, (
            "block_h must be a multiple of 128 that divides hidden")
        bm = clamp_m(block_m if block_m is not None else (1024 if big_vmem else 512))
        while bm > 16 and not fits(bm, block_h, tiled=True):
            bm = clamp_m(bm // 2)
        return bm, block_h

    # --- preferred: weights resident, 1-D grid over rows ---------------------------
    bm = clamp_m(block_m if block_m is not None else 512)
    while bm > 16 and not fits(bm, hidden, tiled=False):
        bm = clamp_m(bm // 2)
    if block_h is not None or fits(bm, hidden, tiled=False):
        return bm, hidden

    # --- weights too large for VMEM: tile hidden, grow row tile for intensity ------
    bm = clamp_m(block_m if block_m is not None else (1024 if big_vmem else 512))
    cands = [c for c in (8192, 4096, 2048, 1024, 512, 256, 128)
             if c < hidden and hidden % c == 0]
    if not cands:
        return bm, hidden  # hidden not 128-divisible: keep resident, rely on vmem budget
    bh = next((c for c in cands if fits(bm, c, tiled=True)), cands[-1])
    while bm > 16 and not fits(bm, bh, tiled=True):
        bm = clamp_m(bm // 2)
    return bm, bh


# ----------------------------------------------------------------------------- wrapper


@functools.partial(jax.jit, static_argnames=("block_m", "block_h"))
def positionwise_feed_forward(x, w1, b1, w2, b2, *, block_m=None, block_h=None):
    """x: (batch, seq, d_model). w1: (d_model, hidden), b1: (1, hidden),
    w2: (hidden, d_model), b2: (1, d_model)."""
    batch, seq, d_model = x.shape
    hidden = w1.shape[1]
    M = batch * seq
    x2d = x.reshape(M, d_model)

    budget = _vmem_budget_bytes()
    bm, bh = _choose_tiles(M, d_model, hidden,
                           x.dtype.itemsize, w1.dtype.itemsize,
                           budget, block_m, block_h)

    # Prefer >=2 row tiles so both megacore halves / TensorCores get work.
    if _cdiv(M, bm) == 1 and bm > 256:
        bm = _round_up(_cdiv(M, 2), 16)

    n_m = _cdiv(M, bm)
    params = pltpu.CompilerParams(
        dimension_semantics=("parallel",) if bh >= hidden else ("parallel", "arbitrary"),
        vmem_limit_bytes=int(budget),
    )

    if bh >= hidden:
        # Resident-weight path: weights fetched exactly once (grid-invariant index maps).
        out2d = pl.pallas_call(
            _ffn_kernel_resident,
            out_shape=jax.ShapeDtypeStruct((M, d_model), x.dtype),
            grid_spec=pltpu.PrefetchScalarGridSpec(
                num_scalar_prefetch=0,
                grid=(n_m,),
                in_specs=[
                    pl.BlockSpec((bm, d_model), lambda i: (i, 0)),        # x row tile
                    pl.BlockSpec((d_model, hidden), lambda i: (0, 0)),    # W1 (resident)
                    pl.BlockSpec((1, hidden), lambda i: (0, 0)),          # b1 (resident)
                    pl.BlockSpec((hidden, d_model), lambda i: (0, 0)),    # W2 (resident)
                    pl.BlockSpec((1, d_model), lambda i: (0, 0)),         # b2 (resident)
                ],
                out_specs=pl.BlockSpec((bm, d_model), lambda i: (i, 0)),
            ),
            compiler_params=params,
        )(x2d, w1, b1, w2, b2)
    else:
        n_h = hidden // bh
        out2d = pl.pallas_call(
            _ffn_kernel_htiled,
            out_shape=jax.ShapeDtypeStruct((M, d_model), x.dtype),
            grid_spec=pltpu.PrefetchScalarGridSpec(
                num_scalar_prefetch=0,
                grid=(n_m, n_h),
                in_specs=[
                    pl.BlockSpec((bm, d_model), lambda i, h: (i, 0)),     # x row tile
                    pl.BlockSpec((d_model, bh), lambda i, h: (0, h)),     # W1 hidden slice
                    pl.BlockSpec((1, bh), lambda i, h: (0, h)),           # b1 hidden slice
                    pl.BlockSpec((bh, d_model), lambda i, h: (h, 0)),     # W2 hidden slice
                    pl.BlockSpec((1, d_model), lambda i, h: (0, 0)),      # b2
                ],
                out_specs=pl.BlockSpec((bm, d_model), lambda i, h: (i, 0)),
                scratch_shapes=[pltpu.VMEM((bm, d_model), jnp.float32)],
            ),
            compiler_params=params,
        )(x2d, w1, b1, w2, b2)

    return out2d.reshape(batch, seq, d_model)


# ----------------------------------------------------------------------------- test


def _init_linear_params(key, in_features, out_features, dtype=jnp.float32):
    """nn.Linear-style uniform(-1/sqrt(fan_in), 1/sqrt(fan_in)); weight pre-transposed
    to (in_features, out_features)."""
    k_w, k_b = jax.random.split(key)
    bound = 1.0 / (in_features ** 0.5)
    w = jax.random.uniform(k_w, (in_features, out_features), dtype, -bound, bound)
    b = jax.random.uniform(k_b, (1, out_features), dtype, -bound, bound)
    return w, b


def _reference(x, w1, b1, w2, b2):
    d_model = x.shape[-1]
    x2 = x.reshape(-1, d_model)
    h = jnp.maximum(jnp.dot(x2, w1, precision=jax.lax.Precision.HIGHEST) + b1, 0.0)
    y = jnp.dot(h, w2, precision=jax.lax.Precision.HIGHEST) + b2
    return y.reshape(x.shape)


if __name__ == "__main__":
    key = jax.random.PRNGKey(0)
    k_x, k_l1, k_l2, k_x2, k_x3, k_l3, k_l4 = jax.random.split(key, 7)

    # small shapes consistent with the module: batch=2, seq=8, d_model=16, hidden=32
    batch, seq, d_model, hidden = 2, 8, 16, 32
    x = jax.random.normal(k_x, (batch, seq, d_model), jnp.float32)
    w1, b1 = _init_linear_params(k_l1, d_model, hidden)
    w2, b2 = _init_linear_params(k_l2, hidden, d_model)

    out = jax.block_until_ready(positionwise_feed_forward(x, w1, b1, w2, b2))
    ref = _reference(x, w1, b1, w2, b2)
    assert out.shape == (batch, seq, d_model)
    assert jnp.allclose(out, ref, atol=2e-5, rtol=2e-5)

    # row count not a multiple of the row tile (exercises the overhanging last M tile)
    x_odd = jax.random.normal(k_x2, (3, 5, d_model), jnp.float32)
    out_odd = jax.block_until_ready(positionwise_feed_forward(x_odd, w1, b1, w2, b2))
    assert out_odd.shape == (3, 5, d_model)
    assert jnp.allclose(out_odd, _reference(x_odd, w1, b1, w2, b2), atol=2e-5, rtol=2e-5)

    # hidden-tiled (2-D grid, f32 accumulator) path, forced via block_h
    d_model2, hidden2 = 128, 512
    x_big = jax.random.normal(k_x3, (2, 64, d_model2), jnp.float32)
    w1b, b1b = _init_linear_params(k_l3, d_model2, hidden2)
    w2b, b2b = _init_linear_params(k_l4, hidden2, d_model2)
    out_big = jax.block_until_ready(
        positionwise_feed_forward(x_big, w1b, b1b, w2b, b2b, block_h=256))
    assert jnp.allclose(out_big, _reference(x_big, w1b, b1b, w2b, b2b),
                        atol=2e-5, rtol=2e-5)

    print("KERNEL_OK")
</pallas_src>

<mosaic_0001>
module attributes {stable_mosaic.version = 11 : i64} {
  func.func @_ffn_kernel_resident(%arg0: i32, %arg1: memref<16x16xf32, #tpu.memory_space<vmem>>, %arg2: memref<16x32xf32, #tpu.memory_space<vmem>>, %arg3: memref<1x32xf32, #tpu.memory_space<vmem>>, %arg4: memref<32x16xf32, #tpu.memory_space<vmem>>, %arg5: memref<1x16xf32, #tpu.memory_space<vmem>>, %arg6: memref<16x16xf32, #tpu.memory_space<vmem>>) attributes {dimension_semantics = [#tpu.dimension_semantics<parallel>], iteration_bounds = array<i64: 1>, scalar_prefetch = 0 : i64, scratch_operands = 0 : i64, tpu.core_type = #tpu.core_type<tc>, window_params = [{transform_indices = @transform_0, window_bounds = array<i64: 16, 16>}, {pipeline_mode = #tpu.pipeline_mode<synchronous>, transform_indices = @transform_1, window_bounds = array<i64: 16, 32>}, {pipeline_mode = #tpu.pipeline_mode<synchronous>, transform_indices = @transform_2, window_bounds = array<i64: 1, 32>}, {pipeline_mode = #tpu.pipeline_mode<synchronous>, transform_indices = @transform_3, window_bounds = array<i64: 32, 16>}, {pipeline_mode = #tpu.pipeline_mode<synchronous>, transform_indices = @transform_4, window_bounds = array<i64: 1, 16>}, {transform_indices = @transform_5, window_bounds = array<i64: 16, 16>}]} {
    %c0 = arith.constant 0 : index
    %c0_0 = arith.constant 0 : index
    %0 = vector.load %arg1[%c0, %c0_0] : memref<16x16xf32, #tpu.memory_space<vmem>>, vector<16x16xf32>
    %c0_1 = arith.constant 0 : index
    %c0_2 = arith.constant 0 : index
    %1 = vector.load %arg2[%c0_1, %c0_2] : memref<16x32xf32, #tpu.memory_space<vmem>>, vector<16x32xf32>
    %cst = arith.constant dense<0.000000e+00> : vector<16x32xf32>
    %2 = tpu.matmul %0, %1, %cst {dimension_numbers = #tpu.dot_dimension_numbers<[1], [0], [0], [1], [0, 0, 1, 1], [], []>} : vector<16x16xf32>, vector<16x32xf32>, vector<16x32xf32> -> vector<16x32xf32>
    %c0_3 = arith.constant 0 : index
    %c0_4 = arith.constant 0 : index
    %3 = vector.load %arg3[%c0_3, %c0_4] : memref<1x32xf32, #tpu.memory_space<vmem>>, vector<1x32xf32>
    %4 = vector.broadcast %3 : vector<1x32xf32> to vector<16x32xf32>
    %5 = arith.addf %2, %4 : vector<16x32xf32>
    %cst_5 = arith.constant 0.000000e+00 : f32
    %6 = vector.broadcast %cst_5 : f32 to vector<16x32xf32>
    %7 = arith.maximumf %5, %6 : vector<16x32xf32>
    %c0_6 = arith.constant 0 : index
    %c0_7 = arith.constant 0 : index
    %8 = vector.load %arg4[%c0_6, %c0_7] : memref<32x16xf32, #tpu.memory_space<vmem>>, vector<32x16xf32>
    %cst_8 = arith.constant dense<0.000000e+00> : vector<16x16xf32>
    %9 = tpu.matmul %7, %8, %cst_8 {dimension_numbers = #tpu.dot_dimension_numbers<[1], [0], [0], [1], [0, 0, 1, 1], [], []>} : vector<16x32xf32>, vector<32x16xf32>, vector<16x16xf32> -> vector<16x16xf32>
    %c0_9 = arith.constant 0 : index
    %c0_10 = arith.constant 0 : index
    %10 = vector.load %arg5[%c0_9, %c0_10] : memref<1x16xf32, #tpu.memory_space<vmem>>, vector<1x16xf32>
    %11 = vector.broadcast %10 : vector<1x16xf32> to vector<16x16xf32>
    %12 = arith.addf %9, %11 : vector<16x16xf32>
    %c0_11 = arith.constant 0 : index
    %c0_12 = arith.constant 0 : index
    %13 = vector.load %arg6[%c0_11, %c0_12] : memref<16x16xf32, #tpu.memory_space<vmem>>, vector<16x16xf32>
    tpu.vector_store %arg6[%c0_11, %c0_12], %12 {strides = array<i32>} : memref<16x16xf32, #tpu.memory_space<vmem>>, vector<16x16xf32>,
    return
  }
  func.func @transform_0(%arg0: i32) -> (i32, i32) {
    %c0_i32 = arith.constant 0 : i32
    %c0_i32_0 = arith.constant 0 : i32
    return %arg0, %c0_i32 : i32, i32
  }
  func.func @transform_1(%arg0: i32) -> (i32, i32) {
    %c0_i32 = arith.constant 0 : i32
    %c0_i32_0 = arith.constant 0 : i32
    %c0_i32_1 = arith.constant 0 : i32
    return %c0_i32, %c0_i32_0 : i32, i32
  }
  func.func @transform_2(%arg0: i32) -> (i32, i32) {
    %c0_i32 = arith.constant 0 : i32
    %c0_i32_0 = arith.constant 0 : i32
    %c0_i32_1 = arith.constant 0 : i32
    return %c0_i32, %c0_i32_0 : i32, i32
  }
  func.func @transform_3(%arg0: i32) -> (i32, i32) {
    %c0_i32 = arith.constant 0 : i32
    %c0_i32_0 = arith.constant 0 : i32
    %c0_i32_1 = arith.constant 0 : i32
    return %c0_i32, %c0_i32_0 : i32, i32
  }
  func.func @transform_4(%arg0: i32) -> (i32, i32) {
    %c0_i32 = arith.constant 0 : i32
    %c0_i32_0 = arith.constant 0 : i32
    %c0_i32_1 = arith.constant 0 : i32
    return %c0_i32, %c0_i32_0 : i32, i32
  }
  func.func @transform_5(%arg0: i32) -> (i32, i32) {
    %c0_i32 = arith.constant 0 : i32
    %c0_i32_0 = arith.constant 0 : i32
    return %arg0, %c0_i32 : i32, i32
  }
}

</mosaic_0001>

<bundles_post_ra>
// kernel: positionwise_feed_forward.1
= control target key start
LH: loop header
LB: loop body
LE: loop exit
PB: predicated region body
PF: predicated region fallthrough
CT: control target
= control target key end

     0   :  { %vm32_vm0 = vcmask 130048   ;;  %s379_s0 = inlined_call_operand.vmem [shape: f32[16,16], index: 0, kind: input, shape index: {}]   ;;  %s380_s1 = inlined_call_operand.vmem [shape: f32[16,32], index: 1, kind: input, shape index: {}]   ;;  %s381_s2 = inlined_call_operand.vmem [shape: f32[1,32], index: 2, kind: input, shape index: {}]   ;;  %s382_s3 = inlined_call_operand.vmem [shape: f32[32,16], index: 3, kind: input, shape index: {}]   ;;  %s383_s4 = inlined_call_operand.vmem [shape: f32[1,16], index: 4, kind: input, shape index: {}]   ;;  %s384_s5 = inlined_call_operand.hbm [shape: f32[16,16], index: 5, kind: output, shape index: {}]  }
   0x1   :  { %v23_v0 = vld [vmem:[%s380_s1] sm:$0xff]  ;;  %v24_v1 = vld [vmem:[%s380_s1 + $0x8] sm:$0xff] }
   0x2   :  { %v21_v2 = vld [vmem:[%s379_s0] sm:$0xff]  ;;  %v261_v3 = vpack.c.bf16 %v24_v1, %v23_v0  ;;  %v117_v5 = vld [vmem:[%s382_s3 + $0x8] sm:$0xff] }
   0x3   :  { %247 = vmatprep.mubr.msk.f32.mxu0 %vm32_vm0, %v21_v2  ;;  %v116_v4 = vld [vmem:[%s382_s3] sm:$0xff] }
   0x4   :  { %v265_v6 = vpack.c.bf16 %v117_v5, %v116_v4 }
   0x5   :  { %10 = vsyncpa [#allocation3], 0  ;;  %262 = vmatprep.subr.bf16.mxu0 %v261_v3  ;;  %v22_v7 = vld [vmem:[%s379_s0 + $0x8] sm:$0xff]  ;;  %v118_v8 = vld [vmem:[%s382_s3 + $0x10] sm:$0xff]  ;;  %vm127_vm1 = vcmask 261120  }
   0x6   :  { %264 = vmatpush3.bf16.msra.mxu0 %v261_v3  ;;  %266 = vmatprep.subr.bf16.mxu1 %v265_v6  ;;  %v119_v9 = vld [vmem:[%s382_s3 + $0x18] sm:$0xff]  ;;  %v227_v11 = vld [vmem:[%s381_s2] ss:$0 sm:$0xff]  ;;  %s300_s3 = smov [#allocation2]  }
   0x7   :  { %268 = vmatpush3.bf16.msra.mxu1 %v265_v6  ;;  %v269_v10 = vpack.c.bf16 %v119_v9, %v118_v8  ;;  %v230_v18 = vld [vmem:[%s383_s4] ss:$0 sm:$0xff]  ;;  %s216_s11 = sshll.u32 %s300_s3, 4  ;;  %s217_s11 = int_to_ptr.vmem [resolvable:$true] %s216_s11 }
   0x8   :  { %s276_s2 = scalar_lea.vmem %s217_s11, 256  ;;  %p281_p1 = scmp.lt.s32.totalorder %s217_s11, %s217_s11 }
   0x9   :  { %248 = vmatmul.mubr.msk.f32.vlgmr.msra.gmra.mrb[0].mxu0 %vm32_vm0, %v22_v7  ;;  %270 = vmatprep.subr.bf16.mxu1 %v269_v10  ;;  %p277_p0 = scmp.ne.s32.totalorder %s217_s11, %s276_s2  ;;  %p282_p2 = scmp.lt.s32.totalorder %s276_s2, %s276_s2 }
   0xb   :  { %272 = vmatpush3.bf16.msra.mxu1 %v269_v10  ;;  %p283_p3 = por %p282_p2, %p281_p1 }
   0xd   :  { %p284_p4 = pnand %p283_p3, %p277_p0 }
  0xdc   :  { %v249_v12 = vpop.f32.mrb[0].mxu0 }
  0xdd   :  { %v111_v13 = vadd.f32 %v249_v12, %v227_v11  ;;  %v105_v14 = vpop.f32.mrb[1].mxu0 }
  0xde   :  { %v106_v15 = vadd.f32 %v227_v11, %v105_v14 }
  0xdf   :  { %v115_v17 = vmax.f32 %v111_v13, 0.0 }
  0xe0   :  { %v114_v16 = vmax.f32 %v106_v15, 0.0 }
  0xe2   :  { %258 = vmatprep.mubr.msk.f32.mxu1 %vm127_vm1, %v114_v16 }
  0xe3   :  { %259 = vmatmul.mubr.msk.f32.vlgmr.msra.gmra.mrb[0].mxu1 %vm127_vm1, %v115_v17 }
 0x1b6   :  { %v260_v19 = vpop.f32.mrb[0].mxu1 }
 0x1b7   :  { %v206_v20 = vadd.f32 %v260_v19, %v230_v18  ;;  %v200_v21 = vpop.f32.mrb[1].mxu1 }
 0x1b8   :  { %v201_v22 = vadd.f32 %v230_v18, %v200_v21 }
 0x1b9   :  { %210 = vst.msk [vmem:[#allocation2 + $0x8] sm:$0xff] %vm32_vm0, %v206_v20 }
 0x1ba   :  { %209 = vst.msk [vmem:[#allocation2] sm:$0xff] %vm32_vm0, %v201_v22 }
 0x1bb   :  { %287 = shalt.err (!%p284_p4)
}
 0x1bc   :  { %s288_s13 = scalar_lea.hbm %s384_s5, 256 }
 0x1bd   :  { %p289_p5 = scmp.ne.s32.totalorder %s384_s5, %s288_s13  ;;  %p292_p6 = scmp.lt.u32.totalorder %s288_s13, %s384_s5 }
 0x1bf   :  { %p294_p7 = pnand %p292_p6, %p289_p5 }
 0x1c1   :  { %297 = shalt.err (!%p294_p7)
}
 0x1c2   :  { %s301_s18 = smov 128   ;;  %s302_s19 = smov 8  }
 0x1c3   :  { %222 = dma.vmem_to_hbm [thread:$0]  %s217_s11, 256, %s384_s5, [#allocation3], %s301_s18, %s301_s18, %s302_s19  }
 0x1c4   :  { %298 = dma.done.wait [#allocation3], 256  }
 0x1c5   :  { %299 = vsyncadd [#allocation3], 4294967040 }
 0x1c6   :  { %226 = vsyncpa [#allocation3], 1 }

</bundles_post_ra>
